<compile_context>
chip_gen: v7x
topology: tpu7x:2x2x1
jax: 0.10.0
libtpu: 0.0.40
codegen_flags: <defaults>
</compile_context>

<pallas_src>
import jax
import jax.numpy as jnp
from jax.experimental import pallas as pl
from jax.experimental.pallas import tpu as pltpu


def _round_up(n: int, m: int) -> int:
    return ((n + m - 1) // m) * m


def _cdiv(a: int, b: int) -> int:
    return -(-a // b)


def fixed_gate_kernel(x_ref, state_ref, w_ref, b_ref, gbias_ref, o_ref):
    # z = x @ W + b   (MXU matmul, f32 accumulation)
    z = jnp.dot(x_ref[...], w_ref[...], preferred_element_type=jnp.float32)
    z = z + b_ref[...]                              # (TM, TN) + (1, TN)
    # Fixed gate: one (1, TN) sigmoid on the EUP (otherwise-idle slot),
    # broadcast over rows by the VPU.
    g = jax.nn.sigmoid(gbias_ref[...])              # (1, TN), f32
    s = state_ref[...].astype(jnp.float32)          # (TM, TN), f32
    # state*g + z*(1-g) == z + g*(state - z)   (one fewer VPU multiply)
    o_ref[...] = (z + g * (s - z)).astype(o_ref.dtype)


_TM_CANDIDATES = (1024, 768, 512, 256, 128, 64, 32, 16, 8)


def _vmem_capacity_bytes() -> int:
    try:
        return int(pltpu.get_tpu_info().vmem_capacity_bytes)
    except Exception:
        return 64 * 1024 * 1024          # conservative: v7x per-TC VMEM


def _largest_fitting(fixed_bytes, per_row_bytes, budget):
    for cand in _TM_CANDIDATES:
        if fixed_bytes + cand * per_row_bytes <= budget:
            return cand
    return None


def fixed_gate(x, state, w, b, gate_bias, *, compute_dtype=None,
               _force_tiled=False, _tm=None, _tn=None):
    """FixedGate forward.

    x, state : (..., D)   activations / recurrent state
    w        : (D, D)     projection weight, pre-transposed (z = x @ w + b)
    b        : (D,)       projection bias
    gate_bias: (D,)       fixed-gate parameter (sigmoid applied inside)
    compute_dtype: optional dtype (e.g. jnp.bfloat16) for the matmul operands
        x and w only; state / output / elementwise math stay full precision.
    _force_tiled/_tm/_tn: test-only overrides for the streamed-W path.
    """
    orig_shape = x.shape
    out_dtype = x.dtype
    d = orig_shape[-1]
    x2 = x.reshape(-1, d)
    s2 = state.reshape(-1, d)
    m = x2.shape[0]

    # Only the matmul operands are downcast (state is not a matmul operand).
    if compute_dtype is not None:
        x2 = x2.astype(compute_dtype)
        w = w.astype(compute_dtype)

    # Lane-dense feature axis: pad D to a multiple of 128 (zeros in the padded
    # K region contribute nothing to the contraction). No padding along M.
    dp = _round_up(max(d, 128), 128)
    if dp != d:
        x2 = jnp.pad(x2, ((0, 0), (0, dp - d)))
        s2 = jnp.pad(s2, ((0, 0), (0, dp - d)))
        w = jnp.pad(w, ((0, dp - d), (0, dp - d)))
        b = jnp.pad(b, (0, dp - d))
        gate_bias = jnp.pad(gate_bias, (0, dp - d))

    # Biases as (1, Dp) f32 rows -> sublane broadcast, full-precision gate.
    b2 = b.reshape(1, dp).astype(jnp.float32)
    g2 = gate_bias.reshape(1, dp).astype(jnp.float32)

    x_it = jnp.dtype(x2.dtype).itemsize
    s_it = jnp.dtype(s2.dtype).itemsize
    o_it = jnp.dtype(out_dtype).itemsize
    w_it = jnp.dtype(w.dtype).itemsize

    # --- Generation-aware VMEM policy. ---------------------------------------
    # ~70% of physical VMEM for the tiling budget, ~85% as the scoped limit
    # handed to Mosaic (headroom for internal scratch / semaphores).
    vmem_cap = _vmem_capacity_bytes()
    budget = min(int(0.70 * vmem_cap), 100 * 1024 * 1024)
    vmem_limit = min(int(0.85 * vmem_cap), 128 * 1024 * 1024)

    # f32 elementwise intermediates (z, s - z, out-before-cast) live per tile.
    f32_tmp = 3 * 4

    # --- Path A: W resident in VMEM (double-buffered by the pipeline). -------
    res_fixed = 2 * dp * dp * w_it + 2 * 2 * dp * 4          # W x2 + b,g x2
    res_per_row = dp * (2 * x_it + 2 * s_it + 2 * o_it + f32_tmp)
    tm_res = _largest_fitting(res_fixed, res_per_row, budget)
    use_resident = (not _force_tiled) and tm_res is not None and (
        tm_res >= 256 or m <= tm_res)

    def _finalize_tm(tm):
        if _tm is not None:
            return max(8, _round_up(_tm, 8))
        # Megacore (v7x): ensure >= 4 row tiles for large M so the "parallel"
        # row axis can be sharded across 2 TensorCores (and stay /256 aligned).
        if m >= 2 * 256:
            tm = min(tm, max(256, _round_up(_cdiv(m, 4), 256)))
        # Sub-32-bit activations pack 16+ rows per vreg: keep TM >= 16.
        if x_it < 4:
            tm = max(tm, 16)
        return min(tm, _round_up(m, 8))       # don't over-pad tiny inputs

    if use_resident:
        tm = _finalize_tm(tm_res)
        grid = (_cdiv(m, tm),)                # ragged tail handled by Pallas
        in_specs = [
            pl.BlockSpec((tm, dp), lambda i: (i, 0)),     # x  (streamed rows)
            pl.BlockSpec((tm, dp), lambda i: (i, 0)),     # state
            pl.BlockSpec((dp, dp), lambda i: (0, 0)),     # W  (VMEM-resident)
            pl.BlockSpec((1, dp), lambda i: (0, 0)),      # linear bias
            pl.BlockSpec((1, dp), lambda i: (0, 0)),      # gate bias
        ]
        out_spec = pl.BlockSpec((tm, dp), lambda i: (i, 0))
        dim_sem = ("parallel",)
    else:
        # --- Path B: stream W over an output-column grid axis. ---------------
        tn = _tn if _tn is not None else min(512, dp)
        tn = max(128, (min(tn, dp) // 128) * 128)
        while True:
            t_fixed = 2 * dp * tn * w_it + 2 * 2 * tn * 4
            t_per_row = 2 * dp * x_it + tn * (2 * s_it + 2 * o_it + f32_tmp)
            tm_t = _largest_fitting(t_fixed, t_per_row, budget)
            if tm_t is not None or tn == 128 or _tn is not None:
                break
            tn = max(128, (tn // 2 // 128) * 128)
        tm = _finalize_tm(tm_t if tm_t is not None else 8)
        grid = (_cdiv(m, tm), _cdiv(dp, tn))  # columns innermost: x stays put
        in_specs = [
            pl.BlockSpec((tm, dp), lambda i, j: (i, 0)),  # x (resident over j)
            pl.BlockSpec((tm, tn), lambda i, j: (i, j)),  # state column slab
            pl.BlockSpec((dp, tn), lambda i, j: (0, j)),  # W column slab
            pl.BlockSpec((1, tn), lambda i, j: (0, j)),   # linear bias slab
            pl.BlockSpec((1, tn), lambda i, j: (0, j)),   # gate bias slab
        ]
        out_spec = pl.BlockSpec((tm, tn), lambda i, j: (i, j))
        dim_sem = ("parallel", "parallel")

    out = pl.pallas_call(
        fixed_gate_kernel,
        out_shape=jax.ShapeDtypeStruct((m, dp), out_dtype),
        grid=grid,
        in_specs=in_specs,
        out_specs=out_spec,
        compiler_params=pltpu.CompilerParams(
            dimension_semantics=dim_sem,
            vmem_limit_bytes=vmem_limit,
        ),
    )(x2, s2, w, b2, g2)

    if dp != d:
        out = out[:, :d]
    return out.reshape(orig_shape)


def fixed_gate_reference(x, state, w, b, gate_bias):
    z = jnp.einsum("...d,de->...e", x, w) + b
    g = jax.nn.sigmoid(gate_bias)
    return state * g + z * (1.0 - g)


if __name__ == "__main__":
    key = jax.random.PRNGKey(0)
    k1, k2, k3, k4, k5 = jax.random.split(key, 5)

    batch, seq, dim = 2, 8, 32
    x = jax.random.normal(k1, (batch, seq, dim), dtype=jnp.float32)
    state = jax.random.normal(k2, (batch, seq, dim), dtype=jnp.float32)

    # nn.Linear(dim, dim): store W transposed so the kernel does x @ W.
    bound = 1.0 / jnp.sqrt(dim)
    w = jax.random.uniform(k3, (dim, dim), minval=-bound, maxval=bound,
                           dtype=jnp.float32)
    b = jax.random.uniform(k4, (dim,), minval=-bound, maxval=bound,
                           dtype=jnp.float32)
    gate_bias = jax.random.normal(k5, (dim,), dtype=jnp.float32)   # torch.randn(dim)

    ref = fixed_gate_reference(x, state, w, b, gate_bias)

    # 1) f32, resident-W path (exact semantics).
    out = jax.block_until_ready(fixed_gate(x, state, w, b, gate_bias))
    assert out.shape == (batch, seq, dim)
    assert out.dtype == x.dtype
    assert jnp.allclose(out, ref, atol=1e-5, rtol=1e-5), "f32 mismatch vs reference"

    # 2) bf16 matmul operands (x, W only); state / output / elementwise stay f32.
    out_bf16 = jax.block_until_ready(
        fixed_gate(x, state, w, b, gate_bias, compute_dtype=jnp.bfloat16))
    assert out_bf16.shape == (batch, seq, dim)
    assert jnp.allclose(out_bf16, ref, atol=3e-2, rtol=3e-2), "bf16 mismatch vs reference"

    # 3) Streamed-W (N-tiled) path + ragged row tail (M=33, TM=16, TN=128).
    kk = jax.random.split(jax.random.PRNGKey(1), 5)
    b3, s3, d3 = 3, 11, 256
    x3 = jax.random.normal(kk[0], (b3, s3, d3), dtype=jnp.float32)
    st3 = jax.random.normal(kk[1], (b3, s3, d3), dtype=jnp.float32)
    bnd = 1.0 / jnp.sqrt(d3)
    w3 = jax.random.uniform(kk[2], (d3, d3), minval=-bnd, maxval=bnd, dtype=jnp.float32)
    bb3 = jax.random.uniform(kk[3], (d3,), minval=-bnd, maxval=bnd, dtype=jnp.float32)
    gb3 = jax.random.normal(kk[4], (d3,), dtype=jnp.float32)
    ref3 = fixed_gate_reference(x3, st3, w3, bb3, gb3)
    out3 = jax.block_until_ready(
        fixed_gate(x3, st3, w3, bb3, gb3, _force_tiled=True, _tm=16, _tn=128))
    assert out3.shape == (b3, s3, d3)
    assert jnp.allclose(out3, ref3, atol=1e-4, rtol=1e-4), "tiled-path mismatch vs reference"

    print("KERNEL_OK")
</pallas_src>

<mosaic_0001>
module attributes {stable_mosaic.version = 11 : i64} {
  func.func @fixed_gate_kernel(%arg0: i32, %arg1: memref<16x128xf32, #tpu.memory_space<vmem>>, %arg2: memref<16x128xf32, #tpu.memory_space<vmem>>, %arg3: memref<128x128xf32, #tpu.memory_space<vmem>>, %arg4: memref<1x128xf32, #tpu.memory_space<vmem>>, %arg5: memref<1x128xf32, #tpu.memory_space<vmem>>, %arg6: memref<16x128xf32, #tpu.memory_space<vmem>>) attributes {dimension_semantics = [#tpu.dimension_semantics<parallel>], iteration_bounds = array<i64: 1>, scalar_prefetch = 0 : i64, scratch_operands = 0 : i64, tpu.core_type = #tpu.core_type<tc>, window_params = [{transform_indices = @transform_0, window_bounds = array<i64: 16, 128>}, {transform_indices = @transform_1, window_bounds = array<i64: 16, 128>}, {pipeline_mode = #tpu.pipeline_mode<synchronous>, transform_indices = @transform_2, window_bounds = array<i64: 128, 128>}, {pipeline_mode = #tpu.pipeline_mode<synchronous>, transform_indices = @transform_3, window_bounds = array<i64: 1, 128>}, {pipeline_mode = #tpu.pipeline_mode<synchronous>, transform_indices = @transform_4, window_bounds = array<i64: 1, 128>}, {transform_indices = @transform_5, window_bounds = array<i64: 16, 128>}]} {
    %c0 = arith.constant 0 : index
    %c0_0 = arith.constant 0 : index
    %0 = vector.load %arg1[%c0, %c0_0] : memref<16x128xf32, #tpu.memory_space<vmem>>, vector<16x128xf32>
    %c0_1 = arith.constant 0 : index
    %c0_2 = arith.constant 0 : index
    %1 = vector.load %arg3[%c0_1, %c0_2] : memref<128x128xf32, #tpu.memory_space<vmem>>, vector<128x128xf32>
    %cst = arith.constant dense<0.000000e+00> : vector<16x128xf32>
    %2 = tpu.matmul %0, %1, %cst {dimension_numbers = #tpu.dot_dimension_numbers<[1], [0], [0], [1], [0, 0, 1, 1], [], []>} : vector<16x128xf32>, vector<128x128xf32>, vector<16x128xf32> -> vector<16x128xf32>
    %c0_3 = arith.constant 0 : index
    %c0_4 = arith.constant 0 : index
    %3 = vector.load %arg4[%c0_3, %c0_4] : memref<1x128xf32, #tpu.memory_space<vmem>>, vector<1x128xf32>
    %4 = vector.broadcast %3 : vector<1x128xf32> to vector<16x128xf32>
    %5 = arith.addf %2, %4 : vector<16x128xf32>
    %c0_5 = arith.constant 0 : index
    %c0_6 = arith.constant 0 : index
    %6 = vector.load %arg5[%c0_5, %c0_6] : memref<1x128xf32, #tpu.memory_space<vmem>>, vector<1x128xf32>
    %7 = arith.negf %6 : vector<1x128xf32>
    %8 = math.exp %7 : vector<1x128xf32>
    %cst_7 = arith.constant 1.000000e+00 : f32
    %9 = vector.broadcast %cst_7 : f32 to vector<1x128xf32>
    %10 = arith.addf %9, %8 : vector<1x128xf32>
    %11 = arith.divf %9, %10 : vector<1x128xf32>
    %c0_8 = arith.constant 0 : index
    %c0_9 = arith.constant 0 : index
    %12 = vector.load %arg2[%c0_8, %c0_9] : memref<16x128xf32, #tpu.memory_space<vmem>>, vector<16x128xf32>
    %13 = arith.subf %12, %5 : vector<16x128xf32>
    %14 = vector.broadcast %11 : vector<1x128xf32> to vector<16x128xf32>
    %15 = arith.mulf %14, %13 : vector<16x128xf32>
    %16 = arith.addf %5, %15 : vector<16x128xf32>
    %c0_10 = arith.constant 0 : index
    %c0_11 = arith.constant 0 : index
    %17 = vector.load %arg6[%c0_10, %c0_11] : memref<16x128xf32, #tpu.memory_space<vmem>>, vector<16x128xf32>
    tpu.vector_store %arg6[%c0_10, %c0_11], %16 {strides = array<i32>} : memref<16x128xf32, #tpu.memory_space<vmem>>, vector<16x128xf32>,
    return
  }
  func.func @transform_0(%arg0: i32) -> (i32, i32) {
    %c0_i32 = arith.constant 0 : i32
    %c0_i32_0 = arith.constant 0 : i32
    return %arg0, %c0_i32 : i32, i32
  }
  func.func @transform_1(%arg0: i32) -> (i32, i32) {
    %c0_i32 = arith.constant 0 : i32
    %c0_i32_0 = arith.constant 0 : i32
    return %arg0, %c0_i32 : i32, i32
  }
  func.func @transform_2(%arg0: i32) -> (i32, i32) {
    %c0_i32 = arith.constant 0 : i32
    %c0_i32_0 = arith.constant 0 : i32
    %c0_i32_1 = arith.constant 0 : i32
    return %c0_i32, %c0_i32_0 : i32, i32
  }
  func.func @transform_3(%arg0: i32) -> (i32, i32) {
    %c0_i32 = arith.constant 0 : i32
    %c0_i32_0 = arith.constant 0 : i32
    %c0_i32_1 = arith.constant 0 : i32
    return %c0_i32, %c0_i32_0 : i32, i32
  }
  func.func @transform_4(%arg0: i32) -> (i32, i32) {
    %c0_i32 = arith.constant 0 : i32
    %c0_i32_0 = arith.constant 0 : i32
    %c0_i32_1 = arith.constant 0 : i32
    return %c0_i32, %c0_i32_0 : i32, i32
  }
  func.func @transform_5(%arg0: i32) -> (i32, i32) {
    %c0_i32 = arith.constant 0 : i32
    %c0_i32_0 = arith.constant 0 : i32
    return %arg0, %c0_i32 : i32, i32
  }
}

</mosaic_0001>

<bundles_post_ra>
// kernel: tpu_custom_call.1
= control target key start
LH: loop header
LB: loop body
LE: loop exit
PB: predicated region body
PF: predicated region fallthrough
CT: control target
= control target key end

     0   :  { %10 = vsyncpa [#allocation3], 0  ;;  %s503_s0 = inlined_call_operand.hbm [shape: f32[16,128], index: 0, kind: input, shape index: {}]   ;;  %s504_s1 = inlined_call_operand.hbm [shape: f32[16,128], index: 1, kind: input, shape index: {}]   ;;  %s505_s2 = inlined_call_operand.hbm [shape: f32[128,128], index: 2, kind: input, shape index: {}]   ;;  %s506_s3 = inlined_call_operand.vmem [shape: f32[1,128], index: 3, kind: input, shape index: {}]   ;;  %s507_s4 = inlined_call_operand.vmem [shape: f32[1,128], index: 4, kind: input, shape index: {}]   ;;  %s508_s5 = inlined_call_operand.hbm [shape: f32[16,128], index: 5, kind: output, shape index: {}]  }
   0x1   :  { %11 = vsyncpa [#allocation6], 0 }
   0x2   :  { %12 = vsyncpa [#allocation4], 0  ;;  %s394_s18 = smov [#allocation5]   ;;  %s395_s20 = smov [#allocation2]  }
   0x3   :  { %s30_s19 = sshll.u32 %s394_s18, 4  ;;  %s18_s21 = sshll.u32 %s395_s20, 4  ;;  %s31_s19 = int_to_ptr.vmem [resolvable:$true] %s30_s19  ;;  %s430_s21 = int_to_ptr.vmem [resolvable:$true] %s18_s21 }
   0x4   :  { %s300_s24 = scalar_lea.hbm %s504_s1, 256 }
   0x5   :  { %p301_p0 = scmp.ne.s32.totalorder %s504_s1, %s300_s24  ;;  %p304_p1 = scmp.lt.u32.totalorder %s300_s24, %s504_s1 }
   0x7   :  { %p306_p2 = pnand %p304_p1, %p301_p0 }
   0x9   :  { %309 = shalt.err (!%p306_p2)
}
   0xa   :  { %s310_s29 = scalar_lea.vmem %s31_s19, 256  ;;  %p315_p4 = scmp.lt.s32.totalorder %s31_s19, %s31_s19 }
   0xb   :  { %p311_p3 = scmp.ne.s32.totalorder %s31_s19, %s310_s29  ;;  %p316_p5 = scmp.lt.s32.totalorder %s310_s29, %s310_s29 }
   0xd   :  { %p317_p6 = por %p316_p5, %p315_p4 }
   0xf   :  { %p318_p7 = pnand %p317_p6, %p311_p3 }
  0x11   :  { %321 = shalt.err (!%p318_p7)
}
  0x12   :  { %s396_s30 = smov 128   ;;  %s397_s6 = smov 8  }
  0x13   :  { %36 = dma.hbm_to_vmem [thread:$0]  %s504_s1, 256, %s31_s19, [#allocation6], %s396_s30, %s396_s30, %s397_s6  }
  0x14   :  { %s322_s11 = scalar_lea.hbm %s503_s0, 256 }
  0x15   :  { %p323_p8 = scmp.ne.s32.totalorder %s503_s0, %s322_s11  ;;  %p326_p9 = scmp.lt.u32.totalorder %s322_s11, %s503_s0 }
  0x17   :  { %p328_p10 = pnand %p326_p9, %p323_p8 }
  0x19   :  { %331 = shalt.err (!%p328_p10)
}
  0x1a   :  { %s332_s16 = scalar_lea.vmem %s430_s21, 256  ;;  %p337_p12 = scmp.lt.s32.totalorder %s430_s21, %s430_s21 }
  0x1b   :  { %p333_p11 = scmp.ne.s32.totalorder %s430_s21, %s332_s16  ;;  %p338_p13 = scmp.lt.s32.totalorder %s332_s16, %s332_s16 }
  0x1d   :  { %p339_p0 = por %p338_p13, %p337_p12 }
  0x1f   :  { %p340_p1 = pnand %p339_p0, %p333_p11 }
  0x21   :  { %343 = shalt.err (!%p340_p1)
}
  0x22   :  { %24 = dma.hbm_to_vmem [thread:$0]  %s503_s0, 256, %s430_s21, [#allocation3], %s396_s30, %s396_s30, %s397_s6  }
  0x23   :  { %s398_s18 = smov [#allocation7]   ;;  %s344_s23 = scalar_lea.hbm %s505_s2, 2048 }
  0x24   :  { %s42_s19 = sshll.u32 %s398_s18, 4  ;;  %p345_p2 = scmp.ne.s32.totalorder %s505_s2, %s344_s23  ;;  %s43_s19 = int_to_ptr.vmem [resolvable:$true] %s42_s19 }
  0x25   :  { %p348_p3 = scmp.lt.u32.totalorder %s344_s23, %s505_s2 }
  0x27   :  { %p350_p4 = pnand %p348_p3, %p345_p2 }
  0x29   :  { %353 = shalt.err (!%p350_p4)
}
  0x2a   :  { %s354_s28 = scalar_lea.vmem %s43_s19, 2048  ;;  %p359_p6 = scmp.lt.s32.totalorder %s43_s19, %s43_s19 }
  0x2b   :  { %p355_p5 = scmp.ne.s32.totalorder %s43_s19, %s354_s28  ;;  %p360_p7 = scmp.lt.s32.totalorder %s354_s28, %s354_s28 }
  0x2d   :  { %p361_p8 = por %p360_p7, %p359_p6 }
  0x2f   :  { %p362_p9 = pnand %p361_p8, %p355_p5 }
  0x31   :  { %365 = shalt.err (!%p362_p9)
}
  0x32   :  { %48 = dma.hbm_to_vmem [thread:$0]  %s505_s2, 2048, %s43_s19, [#allocation6], %s396_s30, %s396_s30, %s397_s6  }
  0x33   :  { %388 = dma.done.wait [#allocation3], 256  }
  0x34   :  { %389 = vsyncadd [#allocation3], 4294967040 }
  0x35   :  { %390 = dma.done.wait [#allocation6], 2304  }
  0x36   :  { %391 = vsyncadd [#allocation6], 4294964992  ;;  %v64_v0 = vld [vmem:[#allocation7] sm:$0xff]  ;;  %v65_v1 = vld [vmem:[#allocation7 + $0x8] sm:$0xff]  ;;  %v174_v30 = vlaneseq }
  0x37   :  { %v66_v2 = vld [vmem:[#allocation7 + $0x10] sm:$0xff]  ;;  %v258_v3 = vpack.c.bf16 %v65_v1, %v64_v0  ;;  %v67_v4 = vld [vmem:[#allocation7 + $0x18] sm:$0xff]  ;;  %v68_v6 = vld [vmem:[#allocation7 + $0x20] sm:$0xff] }
  0x38   :  { %v262_v5 = vpack.c.bf16 %v67_v4, %v66_v2  ;;  %v69_v7 = vld [vmem:[#allocation7 + $0x28] sm:$0xff]  ;;  %v62_v9 = vld [vmem:[#allocation2] sm:$0xff]  ;;  %v70_v10 = vld [vmem:[#allocation7 + $0x30] sm:$0xff]  ;;  %v175_v31 = vshrl.u32 %v174_v30, 7 }
  0x39   :  { %259 = vmatprep.subr.bf16.mxu0 %v258_v3  ;;  %v266_v8 = vpack.c.bf16 %v69_v7, %v68_v6  ;;  %v71_v11 = vld [vmem:[#allocation7 + $0x38] sm:$0xff]  ;;  %255 = vmatprep.mubr.f32.mxu0 %v62_v9  ;;  %v72_v13 = vld [vmem:[#allocation7 + $0x40] sm:$0xff]  ;;  %v73_v14 = vld [vmem:[#allocation7 + $0x48] sm:$0xff] }
  0x3a   :  { %261 = vmatpush3.bf16.msra.mxu0 %v258_v3  ;;  %v270_v12 = vpack.c.bf16 %v71_v11, %v70_v10  ;;  %v274_v15 = vpack.c.bf16 %v73_v14, %v72_v13  ;;  %v74_v16 = vld [vmem:[#allocation7 + $0x50] sm:$0xff]  ;;  %v75_v17 = vld [vmem:[#allocation7 + $0x58] sm:$0xff]  ;;  %v76_v19 = vld [vmem:[#allocation7 + $0x60] sm:$0xff]  ;;  %v176_v32 = vsub.s32 0, %v175_v31 }
  0x3b   :  { %263 = vmatprep.subr.bf16.mxu0 %v262_v5  ;;  %v278_v18 = vpack.c.bf16 %v75_v17, %v74_v16  ;;  %v77_v20 = vld [vmem:[#allocation7 + $0x68] sm:$0xff]  ;;  %v78_v22 = vld [vmem:[#allocation7 + $0x70] sm:$0xff]  ;;  %v79_v23 = vld [vmem:[#allocation7 + $0x78] sm:$0xff] }
  0x3c   :  { %v282_v21 = vpack.c.bf16 %v77_v20, %v76_v19  ;;  %v286_v24 = vpack.c.bf16 %v79_v23, %v78_v22  ;;  %v63_v25 = vld [vmem:[#allocation2 + $0x8] sm:$0xff]  ;;  %v162_v26 = vld [vmem:[%s507_s4] sm:$0x1]  ;;  %v170_v36 = vld [vmem:[#allocation5 + $0x8] sm:$0xff]  ;;  %s399_s4 = smov [#allocation8]  }
  0x3d   :  { %v204_v27 = vmul.f32 -1.442695, %v162_v26  ;;  %v203_v34 = vld [vmem:[%s506_s3] ss:$0 sm:$0xff]  ;;  %v169_v40 = vld [vmem:[#allocation5] sm:$0xff]  ;;  %s190_s9 = sshll.u32 %s399_s4, 4  ;;  %s191_s9 = int_to_ptr.vmem [resolvable:$true] %s190_s9 }
  0x3e   :  { %265 = vmatpush3.bf16.msra.mxu0 %v262_v5  ;;  %s366_s10 = scalar_lea.vmem %s191_s9, 256  ;;  %p371_p11 = scmp.lt.s32.totalorder %s191_s9, %s191_s9 }
  0x3f   :  { %267 = vmatprep.subr.bf16.mxu0 %v266_v8  ;;  %296 = vpow2.f32 %v204_v27  ;;  %p367_p10 = scmp.ne.s32.totalorder %s191_s9, %s366_s10  ;;  %p372_p12 = scmp.lt.s32.totalorder %s366_s10, %s366_s10 }
  0x41   :  { %p373_p13 = por %p372_p12, %p371_p11 }
  0x42   :  { %269 = vmatpush3.bf16.msra.mxu0 %v266_v8 }
  0x43   :  { %271 = vmatprep.subr.bf16.mxu0 %v270_v12  ;;  %p374_p0 = pnand %p373_p13, %p367_p10 }
  0x46   :  { %273 = vmatpush3.bf16.msra.mxu0 %v270_v12 }
  0x47   :  { %275 = vmatprep.subr.bf16.mxu0 %v274_v15 }
  0x49   :  { %v297_v28 = vpop.eup %296 }
  0x4a   :  { %277 = vmatpush3.bf16.msra.mxu0 %v274_v15  ;;  %v166_v29 = vadd.f32 1.0, %v297_v28 }
  0x4b   :  { %279 = vmatprep.subr.bf16.mxu0 %v278_v18 }
  0x4c   :  { %298 = vrcp.f32 %v166_v29 }
  0x4e   :  { %281 = vmatpush3.bf16.msra.mxu0 %v278_v18 }
  0x4f   :  { %283 = vmatprep.subr.bf16.mxu0 %v282_v21 }
  0x52   :  { %285 = vmatpush3.bf16.msra.mxu0 %v282_v21 }
  0x53   :  { %287 = vmatprep.subr.bf16.mxu0 %v286_v24 }
  0x56   :  { %289 = vmatpush3.bf16.msra.mxu0 %v286_v24  ;;  %v299_v33 = vpop.eup %298 }
  0x57   :  { %v177_v38 = vrot.slane %v299_v33, %v176_v32 }
  0x59   :  { %256 = vmatmul.mubr.f32.vlgmr.msra.gmra.mrb[0].mxu0 %v63_v25 }
 0x12c   :  { %v257_v35 = vpop.f32.mrb[0].mxu0 }
 0x12d   :  { %v159_v37 = vadd.f32 %v257_v35, %v203_v34  ;;  %v153_v39 = vpop.f32.mrb[1].mxu0 }
 0x12e   :  { %v154_v41 = vadd.f32 %v203_v34, %v153_v39 }
 0x12f   :  { %v172_v42 = vsub.f32 %v170_v36, %v159_v37 }
 0x130   :  { %v171_v43 = vsub.f32 %v169_v40, %v154_v41 }
 0x131   :  { %v180_v44 = vmul.f32 %v177_v38, %v172_v42 }
 0x132   :  { %v179_v45 = vmul.f32 %v177_v38, %v171_v43 }
 0x133   :  { %v182_v46 = vadd.f32 %v180_v44, %v159_v37 }
 0x134   :  { %v181_v47 = vadd.f32 %v179_v45, %v154_v41 }
 0x135   :  { %184 = vst [vmem:[#allocation8 + $0x8] sm:$0xff] %v182_v46 }
 0x136   :  { %183 = vst [vmem:[#allocation8] sm:$0xff] %v181_v47 }
 0x137   :  { %377 = shalt.err (!%p374_p0)
}
 0x138   :  { %s378_s12 = scalar_lea.hbm %s508_s5, 256 }
 0x139   :  { %p379_p1 = scmp.ne.s32.totalorder %s508_s5, %s378_s12  ;;  %p382_p2 = scmp.lt.u32.totalorder %s378_s12, %s508_s5 }
 0x13b   :  { %p384_p3 = pnand %p382_p2, %p379_p1 }
 0x13d   :  { %387 = shalt.err (!%p384_p3)
}
 0x13e   :  { %196 = dma.vmem_to_hbm [thread:$0]  %s191_s9, 256, %s508_s5, [#allocation4], %s396_s30, %s396_s30, %s397_s6  }
 0x13f   :  { %392 = dma.done.wait [#allocation4], 256  }
 0x140   :  { %393 = vsyncadd [#allocation4], 4294967040 }
 0x141   :  { %200 = vsyncpa [#allocation3], 1 }
 0x142   :  { %201 = vsyncpa [#allocation6], 1 }
 0x143   :  { %202 = vsyncpa [#allocation4], 1 }

</bundles_post_ra>
